<compile_context>
chip_gen: v7x
topology: tpu7x:2x2x1
jax: 0.10.0
libtpu: 0.0.40
codegen_flags: <defaults>
</compile_context>

<pallas_src>
import functools
import math

import jax
import jax.numpy as jnp
from jax import lax
from jax.experimental import pallas as pl
from jax.experimental.pallas import tpu as pltpu


def _round_up(x, m):
    return (x + m - 1) // m * m


def _deinterleave_perm(d):
    # [0,2,...,d-2, 1,3,...,d-1]: maps interleaved (re,im) rotary pairs to
    # contiguous halves so rotary becomes the lane-friendly rotate-half form.
    return jnp.concatenate([jnp.arange(0, d, 2), jnp.arange(1, d, 2)])


# ------------------- Linear: y = x @ W^T (bf16 MXU, f32 acc) -----------------

def _linear_kernel(x_ref, w_ref, o_ref, acc_ref):
    @pl.when(pl.program_id(2) == 0)
    def _init():
        acc_ref[...] = jnp.zeros_like(acc_ref)

    # x: (tm, tk), w: (tn, tk) -> contract last dims (nn.Linear convention).
    acc_ref[...] += lax.dot_general(
        x_ref[...], w_ref[...], (((1,), (1,)), ((), ())),
        preferred_element_type=jnp.float32)

    @pl.when(pl.program_id(2) == pl.num_programs(2) - 1)
    def _finalize():
        o_ref[...] = acc_ref[...].astype(o_ref.dtype)


def pallas_linear(x2d, w, *, out_dtype=None, tm=128, tn=256, tk=512):
    """y = x2d @ w.T (bias=False). bf16 operands, f32 accumulation, padded tiles."""
    m, kdim = x2d.shape
    n, kdim2 = w.shape
    assert kdim == kdim2
    out_dtype = out_dtype or x2d.dtype

    xb = x2d.astype(jnp.bfloat16)
    wb = w.astype(jnp.bfloat16)

    tm = min(tm, _round_up(m, 8))
    tn = min(tn, _round_up(n, 128))
    tkr = min(tk, _round_up(kdim, 128))
    mp, np_, kp = _round_up(m, tm), _round_up(n, tn), _round_up(kdim, tkr)
    if (mp, kp) != (m, kdim):
        xb = jnp.pad(xb, ((0, mp - m), (0, kp - kdim)))
    if (np_, kp) != (n, kdim):
        wb = jnp.pad(wb, ((0, np_ - n), (0, kp - kdim)))

    out = pl.pallas_call(
        _linear_kernel,
        out_shape=jax.ShapeDtypeStruct((mp, np_), out_dtype),
        grid=(mp // tm, np_ // tn, kp // tkr),
        in_specs=[
            pl.BlockSpec((tm, tkr), lambda i, j, k: (i, k)),
            pl.BlockSpec((tn, tkr), lambda i, j, k: (j, k)),
        ],
        out_specs=pl.BlockSpec((tm, tn), lambda i, j, k: (i, j)),
        scratch_shapes=[pltpu.VMEM((tm, tn), jnp.float32)],
        compiler_params=pltpu.CompilerParams(
            dimension_semantics=("parallel", "parallel", "arbitrary")),
    )(xb, wb)
    if (mp, np_) != (m, n):
        out = out[:m, :n]
    return out


# --------- Fused: rotary + in-place KV-cache update + flash SDPA -------------

def _fused_sdpa_kernel(sp_ref, q_ref, knew_ref, vnew_ref, cos_ref, sin_ref,
                       kc_hbm, vc_hbm,
                       o_ref, kc_out, vc_out,
                       kbuf, vbuf, krot_sc, m_sc, l_sc, acc_sc, rsem, wsem,
                       *, tk, scale):
    bi = pl.program_id(0)
    hi = pl.program_id(1)
    s, d = q_ref.shape
    dh = d // 2
    sp = sp_ref[0]

    cos = cos_ref[...]          # (s, d//2) f32
    sin = sin_ref[...]

    def rope(x):                # rotate-half rotary (weights were de-interleaved)
        x1 = x[:, :dh]
        x2 = x[:, dh:]
        return jnp.concatenate([x1 * cos - x2 * sin, x1 * sin + x2 * cos],
                               axis=-1)

    q = rope(q_ref[...].astype(jnp.float32)).astype(kc_out.dtype)
    k_new = rope(knew_ref[...].astype(jnp.float32)).astype(kc_out.dtype)

    # --- in-place cache write of the s new rows (one DMA per cache), hidden
    #     under the attention compute below ---
    krot_sc[...] = k_new
    kw = pltpu.make_async_copy(krot_sc, kc_out.at[bi, hi, pl.ds(sp, s), :],
                               wsem.at[0])
    vw = pltpu.make_async_copy(vnew_ref, vc_out.at[bi, hi, pl.ds(sp, s), :],
                               wsem.at[1])
    kw.start()
    vw.start()

    # --- online softmax state ---
    m_sc[...] = jnp.full_like(m_sc, -jnp.inf)
    l_sc[...] = jnp.zeros_like(l_sc)
    acc_sc[...] = jnp.zeros_like(acc_sc)

    def online_update(kblk, vblk, kpos, bound):
        sc = lax.dot_general(q, kblk, (((1,), (1,)), ((), ())),
                             preferred_element_type=jnp.float32) * scale
        sc = jnp.where(kpos <= bound, sc, -1e30)
        m_prev = m_sc[...]
        m_new = jnp.maximum(m_prev, jnp.max(sc, axis=-1, keepdims=True))
        alpha = jnp.exp(m_prev - m_new)
        p = jnp.exp(sc - m_new)
        l_sc[...] = alpha * l_sc[...] + jnp.sum(p, axis=-1, keepdims=True)
        acc_sc[...] = alpha * acc_sc[...] + lax.dot_general(
            p.astype(vblk.dtype), vblk, (((1,), (0,)), ((), ())),
            preferred_element_type=jnp.float32)
        m_sc[...] = m_new

    # --- flash loop over the cache prefix [0, sp): dynamic trip count,
    #     manual double-buffered DMA of (tk, d) KV blocks ---
    nb = (sp + tk - 1) // tk

    def fetch(t, slot):
        off = pl.multiple_of(t * tk, tk)
        pltpu.make_async_copy(kc_hbm.at[bi, hi, pl.ds(off, tk), :],
                              kbuf.at[slot], rsem.at[0, slot]).start()
        pltpu.make_async_copy(vc_hbm.at[bi, hi, pl.ds(off, tk), :],
                              vbuf.at[slot], rsem.at[1, slot]).start()

    @pl.when(nb > 0)
    def _prime():
        fetch(0, 0)

    @pl.loop(0, nb)
    def _cache_blocks(t):
        slot = t & 1
        pltpu.make_async_copy(kc_hbm.at[bi, hi, pl.ds(0, tk), :],
                              kbuf.at[slot], rsem.at[0, slot]).wait()
        pltpu.make_async_copy(vc_hbm.at[bi, hi, pl.ds(0, tk), :],
                              vbuf.at[slot], rsem.at[1, slot]).wait()

        @pl.when(t + 1 < nb)
        def _next():
            fetch(t + 1, 1 - slot)

        kpos = t * tk + lax.broadcasted_iota(jnp.int32, (s, tk), 1)
        # Every query position is >= sp, so the prefix is visible iff kpos < sp
        # (also masks any straddle region that overlaps the in-flight write).
        online_update(kbuf[slot], vbuf[slot], kpos, sp - 1)

    # --- new rows [sp, sp+s): attend straight from VMEM (causal in the chunk) ---
    kpos_new = lax.broadcasted_iota(jnp.int32, (s, s), 1)
    bound_new = lax.broadcasted_iota(jnp.int32, (s, 1), 0)
    online_update(k_new, vnew_ref[...], kpos_new, bound_new)

    o_ref[...] = (acc_sc[...] *
                  pl.reciprocal(l_sc[...], approx=True)).astype(o_ref.dtype)

    kw.wait()
    vw.wait()


def fused_sdpa_with_kv_cache(q, k_new, v_new, freqs_cos, freqs_sin,
                             k_cache, v_cache, start_pos, *, kv_block=None):
    """q/k_new/v_new: (B, H, S, D) (pre-rotary, de-interleaved head_dim).
    Caches: (B, H, MaxS, D), updated in place (aliased). Returns (out, kc, vc)."""
    b, h, s, d = q.shape
    assert d % 2 == 0
    max_seq = k_cache.shape[2]
    assert k_cache.dtype == v_cache.dtype
    cache_dtype = k_cache.dtype

    tk = min(kv_block if kv_block else 512, max_seq)
    while max_seq % tk:       # tk must evenly tile the cache length
        tk //= 2
    tk = max(tk, 1)

    sp = jnp.asarray(start_pos, jnp.int32).reshape((1,))
    scale = 1.0 / math.sqrt(d)
    kernel = functools.partial(_fused_sdpa_kernel, tk=tk, scale=scale)

    kv_spec = pl.BlockSpec((None, None, s, d), lambda bi, hi: (bi, hi, 0, 0))
    rot_spec = pl.BlockSpec((s, d // 2), lambda bi, hi: (0, 0))

    out, kc_new, vc_new = pl.pallas_call(
        kernel,
        out_shape=(
            jax.ShapeDtypeStruct((b, h, s, d), jnp.bfloat16),
            jax.ShapeDtypeStruct(k_cache.shape, cache_dtype),
            jax.ShapeDtypeStruct(v_cache.shape, cache_dtype),
        ),
        grid=(b, h),
        in_specs=[
            pl.BlockSpec(memory_space=pltpu.MemorySpace.SMEM),   # start_pos
            kv_spec,                                             # q
            kv_spec,                                             # new K rows
            kv_spec,                                             # new V rows
            rot_spec,                                            # cos
            rot_spec,                                            # sin
            pl.BlockSpec(memory_space=pl.ANY),                   # K cache (HBM)
            pl.BlockSpec(memory_space=pl.ANY),                   # V cache (HBM)
        ],
        out_specs=(
            kv_spec,                                             # attention out
            pl.BlockSpec(memory_space=pl.ANY),                   # K cache (alias)
            pl.BlockSpec(memory_space=pl.ANY),                   # V cache (alias)
        ),
        scratch_shapes=[
            pltpu.VMEM((2, tk, d), cache_dtype),                 # K block buffer
            pltpu.VMEM((2, tk, d), cache_dtype),                 # V block buffer
            pltpu.VMEM((s, d), cache_dtype),                     # rotated new K
            pltpu.VMEM((s, 1), jnp.float32),                     # running max
            pltpu.VMEM((s, 1), jnp.float32),                     # running sum
            pltpu.VMEM((s, d), jnp.float32),                     # output acc
            pltpu.SemaphoreType.DMA((2, 2)),                     # read sems
            pltpu.SemaphoreType.DMA((2,)),                       # write sems
        ],
        input_output_aliases={6: 1, 7: 2},                       # in-place caches
        compiler_params=pltpu.CompilerParams(
            dimension_semantics=("parallel", "parallel")),
    )(sp, q.astype(cache_dtype), k_new.astype(cache_dtype),
      v_new.astype(cache_dtype), freqs_cos.astype(jnp.float32),
      freqs_sin.astype(jnp.float32), k_cache, v_cache)
    return out, kc_new, vc_new


# ------------------------------ forward pass --------------------------------

def custom_sdpa_attention_forward(params, x, freqs_cos, freqs_sin, mask,
                                  input_pos, k_cache, v_cache, *, kv_block=None):
    # `mask` kept for signature parity; the fused op applies its own causal mask
    # (matching torch.ops.llama.sdpa_with_kv_cache).
    del mask
    if params["n_local_heads"] != params["n_heads"]:
        # TODO(synk): GQA head-repeat (n_local_heads < n_heads) not implemented.
        raise NotImplementedError("GQA (n_local_heads < n_heads) not supported")

    b, s, dim = x.shape
    h, d = params["n_heads"], params["head_dim"]
    hd = h * d

    # Fold the de-interleave permutation of the interleaved rotary into the
    # wq/wk weight rows (precompute at checkpoint load in production), and fuse
    # the three projections into one matmul (x is read once).
    perm = _deinterleave_perm(d)

    def permute_rows(w):
        return w.reshape(h, d, dim)[:, perm, :].reshape(hd, dim)

    w_qkv = jnp.concatenate(
        [permute_rows(params["wq"]), permute_rows(params["wk"]), params["wv"]],
        axis=0)

    x2d = x.reshape(b * s, dim)
    qkv = pallas_linear(x2d, w_qkv, out_dtype=jnp.bfloat16)     # (b*s, 3*h*d)

    q = qkv[:, :hd].reshape(b, s, h, d)
    k = qkv[:, hd:2 * hd].reshape(b, s, h, d)
    v = qkv[:, 2 * hd:].reshape(b, s, h, d)

    qt = jnp.transpose(q, (0, 2, 1, 3))
    kt = jnp.transpose(k, (0, 2, 1, 3))
    vt = jnp.transpose(v, (0, 2, 1, 3))

    start_pos = input_pos[-1]                  # torch: input_pos[-1].item()
    out_bhsd, kc_new, vc_new = fused_sdpa_with_kv_cache(
        qt, kt, vt, freqs_cos, freqs_sin, k_cache, v_cache, start_pos,
        kv_block=kv_block)

    out2d = jnp.transpose(out_bhsd, (0, 2, 1, 3)).reshape(b * s, dim)
    y = pallas_linear(out2d, params["wo"], out_dtype=x.dtype).reshape(b, s, dim)
    return y, (kc_new, vc_new)


# ------------------------------ pure-JAX reference ---------------------------

def apply_rotary_emb_interleaved(x, cos, sin):
    xr = x[..., 0::2]
    xi = x[..., 1::2]
    c = cos[None, :, None, :]
    s = sin[None, :, None, :]
    out_r = xr * c - xi * s
    out_i = xr * s + xi * c
    return jnp.stack([out_r, out_i], axis=-1).reshape(x.shape)


def reference_forward(params, x, cos, sin, input_pos, k_cache, v_cache):
    b, s, dim = x.shape
    h, d = params["n_heads"], params["head_dim"]
    x2d = x.reshape(b * s, dim)
    q = (x2d @ params["wq"].T).reshape(b, s, h, d)
    k = (x2d @ params["wk"].T).reshape(b, s, h, d)
    v = (x2d @ params["wv"].T).reshape(b, s, h, d).astype(jnp.float32)
    q = apply_rotary_emb_interleaved(q, cos, sin).astype(jnp.float32)
    k = apply_rotary_emb_interleaved(k, cos, sin).astype(jnp.float32)
    sp = int(input_pos[-1])
    qt, kt, vt = (jnp.transpose(t, (0, 2, 1, 3)) for t in (q, k, v))
    kcn = lax.dynamic_update_slice(k_cache, kt, (0, 0, sp, 0))
    vcn = lax.dynamic_update_slice(v_cache, vt, (0, 0, sp, 0))
    max_seq = k_cache.shape[2]
    scale = 1.0 / math.sqrt(d)
    scores = jnp.einsum("bhsd,bhtd->bhst", qt, kcn) * scale
    qpos = sp + jnp.arange(s)[:, None]
    kpos = jnp.arange(max_seq)[None, :]
    scores = jnp.where(kpos <= qpos, scores, -1e30)
    p = jax.nn.softmax(scores, axis=-1)
    out = jnp.einsum("bhst,bhtd->bhsd", p, vcn)
    out = jnp.transpose(out, (0, 2, 1, 3)).reshape(b, s, dim)
    y = (out.reshape(b * s, dim) @ params["wo"].T).reshape(b, s, dim)
    return y, (kcn, vcn)


# ----------------------------------- main ------------------------------------

if __name__ == "__main__":
    B, S, DIM = 2, 8, 32
    N_HEADS, HEAD_DIM = 4, 8          # DIM = N_HEADS * HEAD_DIM
    MAX_SEQ = 32
    START_POS = 12                    # with kv_block=8 -> 2 cache-prefix blocks

    key = jax.random.PRNGKey(0)
    k0, k1, k2, k3, k4, k5, k6 = jax.random.split(key, 7)
    wscale = 1.0 / math.sqrt(DIM)
    params = {
        "wq": jax.random.normal(k0, (N_HEADS * HEAD_DIM, DIM), jnp.float32) * wscale,
        "wk": jax.random.normal(k1, (N_HEADS * HEAD_DIM, DIM), jnp.float32) * wscale,
        "wv": jax.random.normal(k2, (N_HEADS * HEAD_DIM, DIM), jnp.float32) * wscale,
        "wo": jax.random.normal(k3, (DIM, DIM), jnp.float32) * wscale,
        "n_heads": N_HEADS,
        "n_local_heads": N_HEADS,
        "head_dim": HEAD_DIM,
    }

    x = jax.random.normal(k4, (B, S, DIM), jnp.float32)

    # freqs (cos/sin) for absolute positions [START_POS, START_POS + S)
    pos = (START_POS + jnp.arange(S)).astype(jnp.float32)
    inv_freq = 1.0 / (10000.0 ** (jnp.arange(0, HEAD_DIM, 2, dtype=jnp.float32)
                                  / HEAD_DIM))
    angles = pos[:, None] * inv_freq[None, :]
    freqs_cos, freqs_sin = jnp.cos(angles), jnp.sin(angles)

    mask = jnp.zeros((S, MAX_SEQ), jnp.float32)          # accepted but unused
    input_pos = jnp.array([START_POS], jnp.int32)

    # Simulated earlier-decode cache contents.
    k_prefill = 0.1 * jax.random.normal(
        k5, (B, N_HEADS, START_POS, HEAD_DIM), jnp.float32)
    v_prefill = 0.1 * jax.random.normal(
        k6, (B, N_HEADS, START_POS, HEAD_DIM), jnp.float32)

    # Reference caches: f32, torch (interleaved) head_dim order.
    k_cache_ref = jnp.zeros((B, N_HEADS, MAX_SEQ, HEAD_DIM), jnp.float32)
    v_cache_ref = jnp.zeros((B, N_HEADS, MAX_SEQ, HEAD_DIM), jnp.float32)
    k_cache_ref = k_cache_ref.at[:, :, :START_POS, :].set(k_prefill)
    v_cache_ref = v_cache_ref.at[:, :, :START_POS, :].set(v_prefill)

    # Kernel caches: bf16; the K prefix is stored in the kernel's de-interleaved
    # head_dim order (what earlier steps of this kernel would have written).
    perm = _deinterleave_perm(HEAD_DIM)
    k_cache = jnp.zeros((B, N_HEADS, MAX_SEQ, HEAD_DIM), jnp.bfloat16)
    v_cache = jnp.zeros((B, N_HEADS, MAX_SEQ, HEAD_DIM), jnp.bfloat16)
    k_cache = k_cache.at[:, :, :START_POS, :].set(
        k_prefill[..., perm].astype(jnp.bfloat16))
    v_cache = v_cache.at[:, :, :START_POS, :].set(v_prefill.astype(jnp.bfloat16))

    y_ref, (kc_ref, vc_ref) = reference_forward(
        params, x, freqs_cos, freqs_sin, input_pos, k_cache_ref, v_cache_ref)

    y, (kc_new, vc_new) = custom_sdpa_attention_forward(
        params, x, freqs_cos, freqs_sin, mask, input_pos, k_cache, v_cache,
        kv_block=8)
    jax.block_until_ready((y, kc_new, vc_new))

    y_err = float(jnp.max(jnp.abs(y - y_ref)))
    kc_err = float(jnp.max(jnp.abs(kc_new.astype(jnp.float32) - kc_ref[..., perm])))
    vc_err = float(jnp.max(jnp.abs(vc_new.astype(jnp.float32) - vc_ref)))
    print(f"max abs err: y={y_err:.4e} k_cache={kc_err:.4e} v_cache={vc_err:.4e}")

    # bf16 MXU operands / bf16 caches vs f32 reference -> loose-ish tolerances.
    assert jnp.allclose(y, y_ref, atol=8e-2, rtol=8e-2), f"y max abs err {y_err}"
    assert jnp.allclose(kc_new.astype(jnp.float32), kc_ref[..., perm],
                        atol=6e-2, rtol=6e-2), f"k_cache max abs err {kc_err}"
    assert jnp.allclose(vc_new.astype(jnp.float32), vc_ref,
                        atol=6e-2, rtol=6e-2), f"v_cache max abs err {vc_err}"

    print("KERNEL_OK")
</pallas_src>

<mosaic_0001>
module attributes {stable_mosaic.version = 11 : i64} {
  func.func @_linear_kernel(%arg0: i32, %arg1: i32, %arg2: i32, %arg3: memref<16x128xbf16, #tpu.memory_space<vmem>>, %arg4: memref<128x128xbf16, #tpu.memory_space<vmem>>, %arg5: memref<16x128xbf16, #tpu.memory_space<vmem>>, %arg6: memref<16x128xf32, #tpu.memory_space<vmem>>) attributes {dimension_semantics = [#tpu.dimension_semantics<parallel>, #tpu.dimension_semantics<parallel>, #tpu.dimension_semantics<arbitrary>], iteration_bounds = array<i64: 1, 1, 1>, scalar_prefetch = 0 : i64, scratch_operands = 1 : i64, tpu.core_type = #tpu.core_type<tc>, window_params = [{transform_indices = @transform_0, window_bounds = array<i64: 16, 128>}, {transform_indices = @transform_1, window_bounds = array<i64: 128, 128>}, {transform_indices = @transform_2, window_bounds = array<i64: 16, 128>}]} {
    %c0_i32 = arith.constant 0 : i32
    %0 = arith.cmpi eq, %arg2, %c0_i32 : i32
    %1 = arith.extui %0 : i1 to i32
    %c0_i32_0 = arith.constant 0 : i32
    %2 = arith.cmpi ne, %1, %c0_i32_0 : i32
    scf.if %2 {
      %cst_10 = arith.constant 0.000000e+00 : f32
      %12 = vector.broadcast %cst_10 : f32 to vector<16x128xf32>
      %c0_11 = arith.constant 0 : index
      %c0_12 = arith.constant 0 : index
      %13 = vector.load %arg6[%c0_11, %c0_12] : memref<16x128xf32, #tpu.memory_space<vmem>>, vector<16x128xf32>
      tpu.vector_store %arg6[%c0_11, %c0_12], %12 {strides = array<i32>} : memref<16x128xf32, #tpu.memory_space<vmem>>, vector<16x128xf32>,
    } else {
    }
    %c0 = arith.constant 0 : index
    %c0_1 = arith.constant 0 : index
    %3 = vector.load %arg6[%c0, %c0_1] : memref<16x128xf32, #tpu.memory_space<vmem>>, vector<16x128xf32>
    %c0_2 = arith.constant 0 : index
    %c0_3 = arith.constant 0 : index
    %4 = vector.load %arg3[%c0_2, %c0_3] : memref<16x128xbf16, #tpu.memory_space<vmem>>, vector<16x128xbf16>
    %c0_4 = arith.constant 0 : index
    %c0_5 = arith.constant 0 : index
    %5 = vector.load %arg4[%c0_4, %c0_5] : memref<128x128xbf16, #tpu.memory_space<vmem>>, vector<128x128xbf16>
    %cst = arith.constant dense<0.000000e+00> : vector<16x128xf32>
    %6 = tpu.matmul %4, %5, %cst {dimension_numbers = #tpu.dot_dimension_numbers<[1], [1], [0], [0], [0, 0, 1, 0], [], []>} : vector<16x128xbf16>, vector<128x128xbf16>, vector<16x128xf32> -> vector<16x128xf32>
    %7 = arith.addf %3, %6 : vector<16x128xf32>
    %c0_6 = arith.constant 0 : index
    %c0_7 = arith.constant 0 : index
    %8 = vector.load %arg6[%c0_6, %c0_7] : memref<16x128xf32, #tpu.memory_space<vmem>>, vector<16x128xf32>
    tpu.vector_store %arg6[%c0_6, %c0_7], %7 {strides = array<i32>} : memref<16x128xf32, #tpu.memory_space<vmem>>, vector<16x128xf32>,
    %c0_i32_8 = arith.constant 0 : i32
    %9 = arith.cmpi eq, %arg2, %c0_i32_8 : i32
    %10 = arith.extui %9 : i1 to i32
    %c0_i32_9 = arith.constant 0 : i32
    %11 = arith.cmpi ne, %10, %c0_i32_9 : i32
    scf.if %11 {
      %c0_10 = arith.constant 0 : index
      %c0_11 = arith.constant 0 : index
      %12 = vector.load %arg6[%c0_10, %c0_11] : memref<16x128xf32, #tpu.memory_space<vmem>>, vector<16x128xf32>
      %13 = arith.truncf %12 : vector<16x128xf32> to vector<16x128xbf16>
      %c0_12 = arith.constant 0 : index
      %c0_13 = arith.constant 0 : index
      %14 = vector.load %arg5[%c0_12, %c0_13] : memref<16x128xbf16, #tpu.memory_space<vmem>>, vector<16x128xbf16>
      tpu.vector_store %arg5[%c0_12, %c0_13], %13 {strides = array<i32>} : memref<16x128xbf16, #tpu.memory_space<vmem>>, vector<16x128xbf16>,
    } else {
    }
    return
  }
  func.func @transform_0(%arg0: i32, %arg1: i32, %arg2: i32) -> (i32, i32) {
    %c0_i32 = arith.constant 0 : i32
    return %arg0, %arg2 : i32, i32
  }
  func.func @transform_1(%arg0: i32, %arg1: i32, %arg2: i32) -> (i32, i32) {
    %c0_i32 = arith.constant 0 : i32
    return %arg1, %arg2 : i32, i32
  }
  func.func @transform_2(%arg0: i32, %arg1: i32, %arg2: i32) -> (i32, i32) {
    %c0_i32 = arith.constant 0 : i32
    return %arg0, %arg1 : i32, i32
  }
}

</mosaic_0001>

<bundles_post_ra>
// kernel: tpu_custom_call.1
= control target key start
LH: loop header
LB: loop body
LE: loop exit
PB: predicated region body
PF: predicated region fallthrough
CT: control target
= control target key end

     0   :  { %7 = vsyncpa [#allocation4], 0  ;;  %s401_s0 = inlined_call_operand.hbm [shape: bf16[16,128], index: 0, kind: input, shape index: {}]   ;;  %s402_s1 = inlined_call_operand.hbm [shape: bf16[128,128], index: 1, kind: input, shape index: {}]   ;;  %s403_s2 = inlined_call_operand.hbm [shape: bf16[16,128], index: 2, kind: output, shape index: {}]  }
   0x1   :  { %8 = vsyncpa [#allocation7], 0 }
   0x2   :  { %9 = vsyncpa [#allocation5], 0  ;;  %s334_s9 = smov [#allocation3]   ;;  %s262_s13 = scalar_lea.hbm %s401_s0, 128 }
   0x3   :  { %s15_s10 = sshll.u32 %s334_s9, 4  ;;  %p263_p0 = scmp.ne.s32.totalorder %s401_s0, %s262_s13  ;;  %s16_s10 = int_to_ptr.vmem [resolvable:$true] %s15_s10 }
   0x4   :  { %p266_p1 = scmp.lt.u32.totalorder %s262_s13, %s401_s0 }
   0x6   :  { %p268_p2 = pnand %p266_p1, %p263_p0 }
   0x8   :  { %271 = shalt.err (!%p268_p2)
}
   0x9   :  { %s272_s18 = scalar_lea.vmem %s16_s10, 128  ;;  %p277_p4 = scmp.lt.s32.totalorder %s16_s10, %s16_s10 }
   0xa   :  { %p273_p3 = scmp.ne.s32.totalorder %s16_s10, %s272_s18  ;;  %p278_p5 = scmp.lt.s32.totalorder %s272_s18, %s272_s18 }
   0xc   :  { %p279_p6 = por %p278_p5, %p277_p4 }
   0xe   :  { %p280_p7 = pnand %p279_p6, %p273_p3 }
  0x10   :  { %283 = shalt.err (!%p280_p7)
}
  0x11   :  { %s335_s19 = smov 64   ;;  %s336_s20 = smov 4  }
  0x12   :  { %21 = dma.hbm_to_vmem [thread:$0]  %s401_s0, 128, %s16_s10, [#allocation4], %s335_s19, %s335_s19, %s336_s20  }
  0x13   :  { %s337_s23 = smov [#allocation6]   ;;  %s284_s27 = scalar_lea.hbm %s402_s1, 1024 }
  0x14   :  { %s27_s24 = sshll.u32 %s337_s23, 4  ;;  %p285_p8 = scmp.ne.s32.totalorder %s402_s1, %s284_s27  ;;  %s28_s24 = int_to_ptr.vmem [resolvable:$true] %s27_s24 }
  0x15   :  { %p288_p9 = scmp.lt.u32.totalorder %s284_s27, %s402_s1 }
  0x17   :  { %p290_p10 = pnand %p288_p9, %p285_p8 }
  0x19   :  { %293 = shalt.err (!%p290_p10)
}
  0x1a   :  { %s294_s4 = scalar_lea.vmem %s28_s24, 1024  ;;  %p299_p12 = scmp.lt.s32.totalorder %s28_s24, %s28_s24 }
  0x1b   :  { %p295_p11 = scmp.ne.s32.totalorder %s28_s24, %s294_s4  ;;  %p300_p13 = scmp.lt.s32.totalorder %s294_s4, %s294_s4 }
  0x1d   :  { %p301_p0 = por %p300_p13, %p299_p12 }
  0x1f   :  { %p302_p1 = pnand %p301_p0, %p295_p11 }
  0x21   :  { %305 = shalt.err (!%p302_p1)
}
  0x22   :  { %33 = dma.hbm_to_vmem [thread:$0]  %s402_s1, 1024, %s28_s24, [#allocation7], %s335_s19, %s335_s19, %s336_s20  }
  0x23   :  { %328 = dma.done.wait [#allocation4], 128  }
  0x24   :  { %329 = vsyncadd [#allocation4], 4294967168 }
  0x25   :  { %330 = dma.done.wait [#allocation7], 1024  }
  0x26   :  { %331 = vsyncadd [#allocation7], 4294966272  ;;  %v338_v0 = vmov 0.0   ;;  %vm339_vm0 = vmmov 0   ;;  %v253_v1 = vld [vmem:[#allocation6] sm:$0xff]   ;;  %v254_v2 = vld [vmem:[#allocation6 + $0x8] sm:$0xff]  }
  0x27   :  { %226 = vmatprep.subr.bf16.mxu0 %v338_v0  ;;  %242 = vmatprep.mubr.msk.bf16.mxu0 %vm339_vm0, %v338_v0  ;;  %v255_v3 = vld [vmem:[#allocation6 + $0x10] sm:$0xff]   ;;  %v256_v4 = vld [vmem:[#allocation6 + $0x18] sm:$0xff]   ;;  %v257_v5 = vld [vmem:[#allocation6 + $0x20] sm:$0xff]   ;;  %s340_s1 = smov [#allocation8]  }
  0x28   :  { %227 = vmatpush3.bf16.xpose.msra.mxu0 %v253_v1  ;;  %v258_v6 = vld [vmem:[#allocation6 + $0x28] sm:$0xff]   ;;  %v259_v7 = vld [vmem:[#allocation6 + $0x30] sm:$0xff]   ;;  %v260_v8 = vld [vmem:[#allocation6 + $0x38] sm:$0xff]   ;;  %s186_s6 = sshll.u32 %s340_s1, 4  ;;  %s187_s6 = int_to_ptr.vmem [resolvable:$true] %s186_s6 }
  0x29   :  { %228 = vmatprep.subr.bf16.mxu0 %v338_v0  ;;  %v261_v9 = vld [vmem:[#allocation3] sm:$0xff]   ;;  %s306_s7 = scalar_lea.vmem %s187_s6, 128  ;;  %p311_p3 = scmp.lt.s32.totalorder %s187_s6, %s187_s6 }
  0x2a   :  { %p307_p2 = scmp.ne.s32.totalorder %s187_s6, %s306_s7  ;;  %p312_p4 = scmp.lt.s32.totalorder %s306_s7, %s306_s7 }
  0x2c   :  { %p313_p5 = por %p312_p4, %p311_p3 }
  0x2e   :  { %p314_p6 = pnand %p313_p5, %p307_p2 }
  0x30   :  { %229 = vmatpush3.bf16.xpose.msra.mxu0 %v254_v2 }
  0x31   :  { %230 = vmatprep.subr.bf16.mxu0 %v338_v0 }
  0x38   :  { %231 = vmatpush3.bf16.xpose.msra.mxu0 %v255_v3 }
  0x39   :  { %232 = vmatprep.subr.bf16.mxu0 %v338_v0 }
  0x40   :  { %233 = vmatpush3.bf16.xpose.msra.mxu0 %v256_v4 }
  0x41   :  { %234 = vmatprep.subr.bf16.mxu0 %v338_v0 }
  0x48   :  { %235 = vmatpush3.bf16.xpose.msra.mxu0 %v257_v5 }
  0x49   :  { %236 = vmatprep.subr.bf16.mxu0 %v338_v0 }
  0x50   :  { %237 = vmatpush3.bf16.xpose.msra.mxu0 %v258_v6 }
  0x51   :  { %238 = vmatprep.subr.bf16.mxu0 %v338_v0 }
  0x58   :  { %239 = vmatpush3.bf16.xpose.msra.mxu0 %v259_v7 }
  0x59   :  { %240 = vmatprep.subr.bf16.mxu0 %v338_v0 }
  0x60   :  { %241 = vmatpush3.bf16.xpose.msra.mxu0 %v260_v8 }
  0x67   :  { %243 = vmatmul.mubr.bf16.vlgmr.msra.gmra.mrb[0].mxu0 %v261_v9 }
 0x13a   :  { %v155_v10 = vpop.f32.mrb[0].mxu0 }
 0x13b   :  { %v244_v11 = vpop.f32.mrb[1].mxu0 }
 0x13c   :  { %v158_v12 = vpop.f32.mrb[2].mxu0 }
 0x13d   :  { %v215_v13 = vpack.c.bf16 %v158_v12, %v155_v10  ;;  %v245_v14 = vpop.f32.mrb[3].mxu0 }
 0x13f   :  { %216 = vst [vmem:[#allocation8] sm:$0xff] %v215_v13  }
 0x140   :  { %317 = shalt.err (!%p314_p6)
}
 0x141   :  { %s318_s10 = scalar_lea.hbm %s403_s2, 128 }
 0x142   :  { %p319_p7 = scmp.ne.s32.totalorder %s403_s2, %s318_s10  ;;  %p322_p8 = scmp.lt.u32.totalorder %s318_s10, %s403_s2 }
 0x144   :  { %p324_p9 = pnand %p322_p8, %p319_p7 }
 0x146   :  { %327 = shalt.err (!%p324_p9)
}
 0x147   :  { %192 = dma.vmem_to_hbm [thread:$0]  %s187_s6, 128, %s403_s2, [#allocation5], %s335_s19, %s335_s19, %s336_s20  }
 0x148   :  { %332 = dma.done.wait [#allocation5], 128  }
 0x149   :  { %333 = vsyncadd [#allocation5], 4294967168 }
 0x14a   :  { %196 = vsyncpa [#allocation4], 1 }
 0x14b   :  { %197 = vsyncpa [#allocation7], 1 }
 0x14c   :  { %198 = vsyncpa [#allocation5], 1 }

</bundles_post_ra>
